<compile_context>
chip_gen: v5e
topology: v5e:2x2
jax: 0.10.0
libtpu: 0.0.40
codegen_flags: <defaults>
</compile_context>

<pallas_src>
import jax
import jax.numpy as jnp
from jax.experimental import pallas as pl
from jax.experimental.pallas import tpu as pltpu
from jax.scipy.linalg import block_diag


# ----------------------------- fused kernel ---------------------------------

def _ae_fused_kernel(x_ref, w1_ref, b1_ref, w2_ref, b2_ref, w3_ref, b3_ref,
                     w4_ref, b4_ref, o_ref):
    """One batch tile of the full AE forward (all intermediates stay in VMEM/vregs).

    x_ref : (tb, I*D)  f32   flattened activations tile
    w1    : (I*D, I*H) cd    block-diagonal encoder pre-flatten Linear
    b1    : (1, I*H)   f32   bias tiled over instances
    w2    : (I*H, E)   cd    encoder post-flatten Linear
    b2    : (1, E)     f32
    w3    : (E, I*H)   cd    decoder post-flatten Linear
    b3    : (1, I*H)   f32
    w4    : (I*H, I*D) cd    block-diagonal decoder pre-flatten Linear
    b4    : (1, I*D)   f32   bias tiled over instances
    o_ref : (tb, I*D)        lane-dense output tile (one full-width store)
    """
    cd = w1_ref.dtype  # MXU input dtype (bf16 in production; f32 for exactness tests)

    # Encoder Linear 1 (per-instance Linear as one block-diagonal matmul) + ReLU.
    h = jnp.dot(x_ref[...].astype(cd), w1_ref[...],
                preferred_element_type=jnp.float32) + b1_ref[...]
    h = jnp.maximum(h, 0.0)                                   # (tb, I*H)

    # Flatten is implicit (h is already lane-dense). Encoder Linear 2 + ReLU.
    z = jnp.dot(h.astype(cd), w2_ref[...],
                preferred_element_type=jnp.float32) + b2_ref[...]
    z = jnp.maximum(z, 0.0)                                   # (tb, E)
    # (decoder's leading ReLU is a no-op right after this ReLU -> folded away)

    # Decoder Linear 1 + ReLU.
    d = jnp.dot(z.astype(cd), w3_ref[...],
                preferred_element_type=jnp.float32) + b3_ref[...]
    d = jnp.maximum(d, 0.0)                                   # (tb, I*H)

    # Decoder Linear 2 (per-instance Linear as block-diagonal matmul), no activation.
    y = jnp.dot(d.astype(cd), w4_ref[...],
                preferred_element_type=jnp.float32) + b4_ref[...]
    o_ref[...] = y.astype(o_ref.dtype)                        # single lane-dense store


# ------------------------------ wrapper --------------------------------------

def _pick_batch_tile(batch, *, max_rows=512, min_steps=4):
    """Batch tile: multiple of 8 (or the full batch when it is tiny), capped so
    large batches give at least `min_steps` grid steps (pipelining + both TCs)."""
    if batch <= 8:
        return batch                      # full-extent block satisfies the (8,128) rule
    tb = min(max_rows, pl.cdiv(batch, min_steps))
    tb = max(8, (tb // 8) * 8)
    return min(tb, (batch // 8) * 8)


def ae_forward(x, kernel_params, *, batch_tile=None, out_dtype=jnp.float32):
    """Full AE.forward (encode then decode). x: (B, I, D). Returns (B, I, D)."""
    x = jnp.asarray(x, jnp.float32)
    B, I, D = x.shape
    w1, b1, w2, b2, w3, b3, w4, b4 = kernel_params
    IH, E = w2.shape
    H = IH // I
    assert IH == I * H, (I, H, IH)
    assert w1.shape == (I * D, IH) and w3.shape == (E, IH) and w4.shape == (IH, I * D)

    tb = batch_tile if batch_tile is not None else _pick_batch_tile(B)
    assert tb == B or tb % 8 == 0, (B, tb)
    grid = (pl.cdiv(B, tb),)              # ragged last block is fine (masked writeback)

    x_flat = x.reshape(B, I * D)          # nn.Flatten absorbed into layout plumbing

    cd = jnp.dtype(w1.dtype)
    w_bytes = sum(int(w.size) * w.dtype.itemsize for w in (w1, w2, w3, w4))
    b_bytes = sum(int(b.size) * 4 for b in (b1, b2, b3, b4))
    # double-buffered weights + double-buffered x/out tiles + in-kernel temporaries
    vmem_est = (2 * (w_bytes + b_bytes)
                + 4 * tb * I * D * 4
                + 2 * tb * (2 * IH + E) * (4 + cd.itemsize))
    try:
        vmem_cap = int(pltpu.get_tpu_info().vmem_capacity_bytes)
    except Exception:
        vmem_cap = 64 * 1024 * 1024       # v7x per-TC VMEM (smallest generation)
    vmem_limit = int(min(max(2 * vmem_est, 32 * 1024 * 1024), 0.9 * vmem_cap))

    flops = 2 * B * (I * D * IH + IH * E + E * IH + IH * I * D)
    bytes_accessed = (x.size + B * I * D) * 4 + w_bytes + b_bytes

    const2 = lambda i: (0, 0)             # weights/biases resident across grid steps

    out = pl.pallas_call(
        _ae_fused_kernel,
        out_shape=jax.ShapeDtypeStruct((B, I * D), out_dtype),
        grid=grid,
        in_specs=[
            pl.BlockSpec((tb, I * D), lambda i: (i, 0)),   # x: tiled over batch
            pl.BlockSpec((I * D, IH), const2),             # w1 (block-diagonal)
            pl.BlockSpec((1, IH), const2),                 # b1 (tiled)
            pl.BlockSpec((IH, E), const2),                 # w2
            pl.BlockSpec((1, E), const2),                  # b2
            pl.BlockSpec((E, IH), const2),                 # w3
            pl.BlockSpec((1, IH), const2),                 # b3
            pl.BlockSpec((IH, I * D), const2),             # w4 (block-diagonal)
            pl.BlockSpec((1, I * D), const2),              # b4 (tiled)
        ],
        out_specs=pl.BlockSpec((tb, I * D), lambda i: (i, 0)),   # lane-dense slab
        compiler_params=pltpu.CompilerParams(
            dimension_semantics=("parallel",),
            vmem_limit_bytes=vmem_limit),
        cost_estimate=pl.CostEstimate(flops=flops, transcendentals=0,
                                      bytes_accessed=bytes_accessed),
    )(x_flat, w1, b1, w2, b2, w3, b3, w4, b4)

    return out.reshape(B, I, D)           # nn.Unflatten


# --------------------------- params & param prep -----------------------------

def init_ae_params(key, n_instance, n_dim, hidden_dim):
    """Deterministic params mirroring AE.__init__ (PyTorch nn.Linear init).

    Weights are stored PRE-TRANSPOSED as (in, out); biases as (out,).
    """
    embed_dim = int(n_instance * hidden_dim / 2)   # div = 2.0 from get_coefs(1.0)
    layer_dims = [
        (hidden_dim, n_dim),                       # encoder Linear (pre-flatten)
        (embed_dim, n_instance * hidden_dim),      # encoder Linear (post-flatten)
        (n_instance * hidden_dim, embed_dim),      # decoder Linear (post-flatten, reversed)
        (n_dim, hidden_dim),                       # decoder Linear (pre-flatten, reversed)
    ]
    params = []
    for idx, (out_d, in_d) in enumerate(layer_dims):
        kw, kb = jax.random.split(jax.random.fold_in(key, idx))
        bound = 1.0 / (in_d ** 0.5)
        w = jax.random.uniform(kw, (out_d, in_d), jnp.float32, -bound, bound)
        b = jax.random.uniform(kb, (out_d,), jnp.float32, -bound, bound)
        params.append((w.T, b))                    # one-time transpose at init
    return params, embed_dim


def prepare_kernel_params(params, n_instance, *, compute_dtype=jnp.bfloat16):
    """Build kernel-ready operands ONCE (not per forward):

      * block-diagonal W1_bd (I*D, I*H) / W4_bd (I*H, I*D) so the per-instance
        Linears become single lane-dense MXU matmuls,
      * instance-tiled biases b1 / b4,
      * weights cast to `compute_dtype` (bf16 by default) for the MXU; biases
        stay f32 (added after f32 accumulation).
    """
    (w1, b1), (w2, b2), (w3, b3), (w4, b4) = params    # (in, out) weights
    I = n_instance
    cd = jnp.dtype(compute_dtype)
    w1_bd = block_diag(*([w1] * I)).astype(cd)         # (I*D, I*H)
    w4_bd = block_diag(*([w4] * I)).astype(cd)         # (I*H, I*D)
    b1_t = jnp.tile(jnp.asarray(b1, jnp.float32), I).reshape(1, -1)
    b4_t = jnp.tile(jnp.asarray(b4, jnp.float32), I).reshape(1, -1)
    return (w1_bd, b1_t,
            jnp.asarray(w2, cd), jnp.asarray(b2, jnp.float32).reshape(1, -1),
            jnp.asarray(w3, cd), jnp.asarray(b3, jnp.float32).reshape(1, -1),
            w4_bd, b4_t)


# ------------------------------ reference ------------------------------------

def ae_forward_ref(x, params):
    """Pure-JAX reference for correctness (params hold dense (in,out) weights)."""
    B, I, D = x.shape
    (w1, b1), (w2, b2), (w3, b3), (w4, b4) = params
    H = w1.shape[1]
    h = jax.nn.relu(x @ w1 + b1)                   # (B, I, H)
    f = h.reshape(B, I * H)                        # nn.Flatten
    z = jax.nn.relu(f @ w2 + b2)                   # (B, embed)
    z = jax.nn.relu(z)                             # decoder's leading ReLU (no-op)
    d = jax.nn.relu(z @ w3 + b3)                   # (B, I*H)
    u = d.reshape(B, I, H)                         # nn.Unflatten
    return u @ w4 + b4                             # (B, I, D)


if __name__ == "__main__":
    B, n_instance, n_dim, hidden_dim = 2, 8, 32, 16

    key = jax.random.PRNGKey(0)
    k_x, k_p = jax.random.split(key)
    x = jax.random.normal(k_x, (B, n_instance, n_dim), dtype=jnp.float32)
    params, embed_dim = init_ae_params(k_p, n_instance, n_dim, hidden_dim)

    ref = ae_forward_ref(x, params)

    # 1) Exactness check in f32 (verifies the block-diagonal restructuring).
    kp_f32 = prepare_kernel_params(params, n_instance, compute_dtype=jnp.float32)
    out_f32 = jax.block_until_ready(jax.jit(ae_forward)(x, kp_f32))
    assert out_f32.shape == (B, n_instance, n_dim), out_f32.shape
    assert jnp.allclose(out_f32, ref, atol=1e-4, rtol=1e-4), "f32 mismatch vs JAX reference"

    # 2) Production path: bf16 MXU inputs, f32 accumulation (looser tolerance).
    kp_bf16 = prepare_kernel_params(params, n_instance)          # default bf16
    out_bf16 = jax.block_until_ready(jax.jit(ae_forward)(x, kp_bf16))
    err = float(jnp.max(jnp.abs(out_bf16 - ref)))
    scale = float(jnp.max(jnp.abs(ref)))
    assert err <= 5e-2 * scale + 5e-2, ("bf16 mismatch vs JAX reference", err, scale)

    print("KERNEL_OK")
</pallas_src>

<mosaic_0001>
module attributes {stable_mosaic.version = 11 : i64} {
  func.func @_ae_fused_kernel(%arg0: i32, %arg1: memref<2x256xf32, #tpu.memory_space<vmem>>, %arg2: memref<256x128xf32, #tpu.memory_space<vmem>>, %arg3: memref<1x128xf32, #tpu.memory_space<vmem>>, %arg4: memref<128x64xf32, #tpu.memory_space<vmem>>, %arg5: memref<1x64xf32, #tpu.memory_space<vmem>>, %arg6: memref<64x128xf32, #tpu.memory_space<vmem>>, %arg7: memref<1x128xf32, #tpu.memory_space<vmem>>, %arg8: memref<128x256xf32, #tpu.memory_space<vmem>>, %arg9: memref<1x256xf32, #tpu.memory_space<vmem>>, %arg10: memref<2x256xf32, #tpu.memory_space<vmem>>) attributes {dimension_semantics = [#tpu.dimension_semantics<parallel>], iteration_bounds = array<i64: 1>, scalar_prefetch = 0 : i64, scratch_operands = 0 : i64, tpu.core_type = #tpu.core_type<tc>, window_params = [{transform_indices = @transform_0, window_bounds = array<i64: 2, 256>}, {pipeline_mode = #tpu.pipeline_mode<synchronous>, transform_indices = @transform_1, window_bounds = array<i64: 256, 128>}, {pipeline_mode = #tpu.pipeline_mode<synchronous>, transform_indices = @transform_2, window_bounds = array<i64: 1, 128>}, {pipeline_mode = #tpu.pipeline_mode<synchronous>, transform_indices = @transform_3, window_bounds = array<i64: 128, 64>}, {pipeline_mode = #tpu.pipeline_mode<synchronous>, transform_indices = @transform_4, window_bounds = array<i64: 1, 64>}, {pipeline_mode = #tpu.pipeline_mode<synchronous>, transform_indices = @transform_5, window_bounds = array<i64: 64, 128>}, {pipeline_mode = #tpu.pipeline_mode<synchronous>, transform_indices = @transform_6, window_bounds = array<i64: 1, 128>}, {pipeline_mode = #tpu.pipeline_mode<synchronous>, transform_indices = @transform_7, window_bounds = array<i64: 128, 256>}, {pipeline_mode = #tpu.pipeline_mode<synchronous>, transform_indices = @transform_8, window_bounds = array<i64: 1, 256>}, {transform_indices = @transform_9, window_bounds = array<i64: 2, 256>}]} {
    %c0 = arith.constant 0 : index
    %c0_0 = arith.constant 0 : index
    %0 = vector.load %arg1[%c0, %c0_0] : memref<2x256xf32, #tpu.memory_space<vmem>>, vector<2x256xf32>
    %c0_1 = arith.constant 0 : index
    %c0_2 = arith.constant 0 : index
    %1 = vector.load %arg2[%c0_1, %c0_2] : memref<256x128xf32, #tpu.memory_space<vmem>>, vector<256x128xf32>
    %cst = arith.constant dense<0.000000e+00> : vector<2x128xf32>
    %2 = tpu.matmul %0, %1, %cst {dimension_numbers = #tpu.dot_dimension_numbers<[1], [0], [0], [1], [0, 0, 1, 1], [], []>} : vector<2x256xf32>, vector<256x128xf32>, vector<2x128xf32> -> vector<2x128xf32>
    %c0_3 = arith.constant 0 : index
    %c0_4 = arith.constant 0 : index
    %3 = vector.load %arg3[%c0_3, %c0_4] : memref<1x128xf32, #tpu.memory_space<vmem>>, vector<1x128xf32>
    %4 = vector.broadcast %3 : vector<1x128xf32> to vector<2x128xf32>
    %5 = arith.addf %2, %4 : vector<2x128xf32>
    %cst_5 = arith.constant 0.000000e+00 : f32
    %6 = vector.broadcast %cst_5 : f32 to vector<2x128xf32>
    %7 = arith.maximumf %5, %6 : vector<2x128xf32>
    %c0_6 = arith.constant 0 : index
    %c0_7 = arith.constant 0 : index
    %8 = vector.load %arg4[%c0_6, %c0_7] : memref<128x64xf32, #tpu.memory_space<vmem>>, vector<128x64xf32>
    %cst_8 = arith.constant dense<0.000000e+00> : vector<2x64xf32>
    %9 = tpu.matmul %7, %8, %cst_8 {dimension_numbers = #tpu.dot_dimension_numbers<[1], [0], [0], [1], [0, 0, 1, 1], [], []>} : vector<2x128xf32>, vector<128x64xf32>, vector<2x64xf32> -> vector<2x64xf32>
    %c0_9 = arith.constant 0 : index
    %c0_10 = arith.constant 0 : index
    %10 = vector.load %arg5[%c0_9, %c0_10] : memref<1x64xf32, #tpu.memory_space<vmem>>, vector<1x64xf32>
    %11 = vector.broadcast %10 : vector<1x64xf32> to vector<2x64xf32>
    %12 = arith.addf %9, %11 : vector<2x64xf32>
    %cst_11 = arith.constant 0.000000e+00 : f32
    %13 = vector.broadcast %cst_11 : f32 to vector<2x64xf32>
    %14 = arith.maximumf %12, %13 : vector<2x64xf32>
    %c0_12 = arith.constant 0 : index
    %c0_13 = arith.constant 0 : index
    %15 = vector.load %arg6[%c0_12, %c0_13] : memref<64x128xf32, #tpu.memory_space<vmem>>, vector<64x128xf32>
    %cst_14 = arith.constant dense<0.000000e+00> : vector<2x128xf32>
    %16 = tpu.matmul %14, %15, %cst_14 {dimension_numbers = #tpu.dot_dimension_numbers<[1], [0], [0], [1], [0, 0, 1, 1], [], []>} : vector<2x64xf32>, vector<64x128xf32>, vector<2x128xf32> -> vector<2x128xf32>
    %c0_15 = arith.constant 0 : index
    %c0_16 = arith.constant 0 : index
    %17 = vector.load %arg7[%c0_15, %c0_16] : memref<1x128xf32, #tpu.memory_space<vmem>>, vector<1x128xf32>
    %18 = vector.broadcast %17 : vector<1x128xf32> to vector<2x128xf32>
    %19 = arith.addf %16, %18 : vector<2x128xf32>
    %cst_17 = arith.constant 0.000000e+00 : f32
    %20 = vector.broadcast %cst_17 : f32 to vector<2x128xf32>
    %21 = arith.maximumf %19, %20 : vector<2x128xf32>
    %c0_18 = arith.constant 0 : index
    %c0_19 = arith.constant 0 : index
    %22 = vector.load %arg8[%c0_18, %c0_19] : memref<128x256xf32, #tpu.memory_space<vmem>>, vector<128x256xf32>
    %cst_20 = arith.constant dense<0.000000e+00> : vector<2x256xf32>
    %23 = tpu.matmul %21, %22, %cst_20 {dimension_numbers = #tpu.dot_dimension_numbers<[1], [0], [0], [1], [0, 0, 1, 1], [], []>} : vector<2x128xf32>, vector<128x256xf32>, vector<2x256xf32> -> vector<2x256xf32>
    %c0_21 = arith.constant 0 : index
    %c0_22 = arith.constant 0 : index
    %24 = vector.load %arg9[%c0_21, %c0_22] : memref<1x256xf32, #tpu.memory_space<vmem>>, vector<1x256xf32>
    %25 = vector.broadcast %24 : vector<1x256xf32> to vector<2x256xf32>
    %26 = arith.addf %23, %25 : vector<2x256xf32>
    %c0_23 = arith.constant 0 : index
    %c0_24 = arith.constant 0 : index
    %27 = vector.load %arg10[%c0_23, %c0_24] : memref<2x256xf32, #tpu.memory_space<vmem>>, vector<2x256xf32>
    tpu.vector_store %arg10[%c0_23, %c0_24], %26 {strides = array<i32>} : memref<2x256xf32, #tpu.memory_space<vmem>>, vector<2x256xf32>,
    return
  }
  func.func @transform_0(%arg0: i32) -> (i32, i32) {
    %c0_i32 = arith.constant 0 : i32
    %c0_i32_0 = arith.constant 0 : i32
    return %arg0, %c0_i32 : i32, i32
  }
  func.func @transform_1(%arg0: i32) -> (i32, i32) {
    %c0_i32 = arith.constant 0 : i32
    %c0_i32_0 = arith.constant 0 : i32
    %c0_i32_1 = arith.constant 0 : i32
    return %c0_i32, %c0_i32_0 : i32, i32
  }
  func.func @transform_2(%arg0: i32) -> (i32, i32) {
    %c0_i32 = arith.constant 0 : i32
    %c0_i32_0 = arith.constant 0 : i32
    %c0_i32_1 = arith.constant 0 : i32
    return %c0_i32, %c0_i32_0 : i32, i32
  }
  func.func @transform_3(%arg0: i32) -> (i32, i32) {
    %c0_i32 = arith.constant 0 : i32
    %c0_i32_0 = arith.constant 0 : i32
    %c0_i32_1 = arith.constant 0 : i32
    return %c0_i32, %c0_i32_0 : i32, i32
  }
  func.func @transform_4(%arg0: i32) -> (i32, i32) {
    %c0_i32 = arith.constant 0 : i32
    %c0_i32_0 = arith.constant 0 : i32
    %c0_i32_1 = arith.constant 0 : i32
    return %c0_i32, %c0_i32_0 : i32, i32
  }
  func.func @transform_5(%arg0: i32) -> (i32, i32) {
    %c0_i32 = arith.constant 0 : i32
    %c0_i32_0 = arith.constant 0 : i32
    %c0_i32_1 = arith.constant 0 : i32
    return %c0_i32, %c0_i32_0 : i32, i32
  }
  func.func @transform_6(%arg0: i32) -> (i32, i32) {
    %c0_i32 = arith.constant 0 : i32
    %c0_i32_0 = arith.constant 0 : i32
    %c0_i32_1 = arith.constant 0 : i32
    return %c0_i32, %c0_i32_0 : i32, i32
  }
  func.func @transform_7(%arg0: i32) -> (i32, i32) {
    %c0_i32 = arith.constant 0 : i32
    %c0_i32_0 = arith.constant 0 : i32
    %c0_i32_1 = arith.constant 0 : i32
    return %c0_i32, %c0_i32_0 : i32, i32
  }
  func.func @transform_8(%arg0: i32) -> (i32, i32) {
    %c0_i32 = arith.constant 0 : i32
    %c0_i32_0 = arith.constant 0 : i32
    %c0_i32_1 = arith.constant 0 : i32
    return %c0_i32, %c0_i32_0 : i32, i32
  }
  func.func @transform_9(%arg0: i32) -> (i32, i32) {
    %c0_i32 = arith.constant 0 : i32
    %c0_i32_0 = arith.constant 0 : i32
    return %arg0, %c0_i32 : i32, i32
  }
}

</mosaic_0001>

<bundles_post_ra>
// kernel: ae_forward.1
= control target key start
LH: loop header
LB: loop body
LE: loop exit
PB: predicated region body
PF: predicated region fallthrough
CT: control target
= control target key end

     0   :  { %14 = vsyncpa [#allocation3], 0  ;;  %s531_s0 = inlined_call_operand.vmem [shape: f32[2,256], index: 0, kind: input, shape index: {}]   ;;  %s532_s1 = inlined_call_operand.hbm [shape: f32[256,128], index: 1, kind: input, shape index: {}]   ;;  %s533_s2 = inlined_call_operand.vmem [shape: f32[1,128], index: 2, kind: input, shape index: {}]   ;;  %s534_s3 = inlined_call_operand.vmem [shape: f32[128,64], index: 3, kind: input, shape index: {}]   ;;  %s535_s4 = inlined_call_operand.vmem [shape: f32[1,64], index: 4, kind: input, shape index: {}]   ;;  %s536_s5 = inlined_call_operand.vmem [shape: f32[64,128], index: 5, kind: input, shape index: {}]   ;;  %s537_s6 = inlined_call_operand.vmem [shape: f32[1,128], index: 6, kind: input, shape index: {}]   ;;  %s538_s7 = inlined_call_operand.hbm [shape: f32[128,256], index: 7, kind: input, shape index: {}]   ;;  %s539_s8 = inlined_call_operand.vmem [shape: f32[1,256], index: 8, kind: input, shape index: {}]   ;;  %s540_s9 = inlined_call_operand.vmem [shape: f32[2,256], index: 9, kind: output, shape index: {}]  }
   0x1   :  { %s22_s11 = sshll.u32 %s532_s1, 4  ;;  %s23_s11 = int_to_ptr.hbm [resolvable:$true] %s22_s11 }
   0x2   :  { %15 = vsyncpa [#allocation5], 0  ;;  %s379_s12 = smov [#allocation2]   ;;  %s45_s16 = sshll.u32 %s538_s7, 4  ;;  %s46_s16 = int_to_ptr.hbm [resolvable:$true] %s45_s16 }
   0x3   :  { %s24_s13 = sshll.u32 %s379_s12, 4  ;;  %s380_s17 = smov 128   ;;  %s25_s13 = int_to_ptr.vmem [resolvable:$true] %s24_s13 }
   0x4   :  { %s381_s18 = smov 8   ;;  %s382_s19 = smov [#allocation4]  }
   0x5   :  { %30 = dma.hbm_to_vmem [thread:$0]  %s23_s11, 4096, %s25_s13, [#allocation3], %s380_s17, %s380_s17, %s381_s18  }
   0x6   :  { %s47_s20 = sshll.u32 %s382_s19, 4  ;;  %s383_s21 = smov 256   ;;  %s48_s20 = int_to_ptr.vmem [resolvable:$true] %s47_s20 }
   0x7   :  { %s384_s22 = smov 16  }
   0x8   :  { %53 = dma.hbm_to_vmem [thread:$0]  %s46_s16, 4096, %s48_s20, [#allocation5], %s383_s21, %s383_s21, %s384_s22  }
   0x9   :  { %375 = dma.done.wait [#allocation3], 4096  }
   0xa   :  { %376 = vsyncadd [#allocation3], 4294963200 }
   0xb   :  { %377 = dma.done.wait [#allocation5], 4096  }
   0xc   :  { %378 = vsyncadd [#allocation5], 4294963200  ;;  %v80_v0 = vld [vmem:[#allocation2 + $0x78] sm:$0xff]  ;;  %v79_v1 = vld [vmem:[#allocation2 + $0x70] sm:$0xff]  ;;  %vm201_vm0 = vcmask 523264   ;;  %vm307_vm1 = vcmask 1041408  }
   0xd   :  { %v96_v2 = vld [vmem:[#allocation2 + $0xf8] sm:$0xff]  ;;  %107 = vmatpush.msra.mxu0 %v80_v0  ;;  %v95_v3 = vld [vmem:[#allocation2 + $0xf0] sm:$0xff]  ;;  %v78_v4 = vld [vmem:[#allocation2 + $0x68] sm:$0xff] }
   0xe   :  { %127 = vmatpush.msra.mxu1 %v96_v2  ;;  %v94_v5 = vld [vmem:[#allocation2 + $0xe8] sm:$0xff]  ;;  %v77_v6 = vld [vmem:[#allocation2 + $0x60] sm:$0xff]  ;;  %v76_v8 = vld [vmem:[#allocation2 + $0x58] sm:$0xff] }
   0xf   :  { %108 = vmatpush.msra.mxu0 %v79_v1  ;;  %v93_v7 = vld [vmem:[#allocation2 + $0xe0] sm:$0xff]  ;;  %v92_v9 = vld [vmem:[#allocation2 + $0xd8] sm:$0xff]  ;;  %v75_v10 = vld [vmem:[#allocation2 + $0x50] sm:$0xff] }
  0x10   :  { %128 = vmatpush.msra.mxu1 %v95_v3  ;;  %v91_v11 = vld [vmem:[#allocation2 + $0xd0] sm:$0xff]  ;;  %v74_v12 = vld [vmem:[#allocation2 + $0x48] sm:$0xff]  ;;  %v64_v14 = vld [vmem:[%s531_s0] sm:$0xf] }
  0x11   :  { %109 = vmatpush.msra.mxu0 %v78_v4  ;;  %v90_v13 = vld [vmem:[#allocation2 + $0xc8] sm:$0xff]  ;;  %102 = vst [vmem:[#allocation1] ss:$4 sm:$0xff] %v64_v14  ;;  %v163_v15 = vld [vmem:[%s534_s3 + $0x78] sm:$0xff]  ;;  %v73_v17 = vld [vmem:[#allocation2 + $0x40] sm:$0xff] }
  0x12   :  { %129 = vmatpush.msra.mxu1 %v94_v5  ;;  %v162_v16 = vld [vmem:[%s534_s3 + $0x70] sm:$0xff]  ;;  %v89_v18 = vld [vmem:[#allocation2 + $0xc0] sm:$0xff]  ;;  %168 = vmatpush.msra.mxu2 %v163_v15  ;;  %v72_v20 = vld [vmem:[#allocation2 + $0x38] sm:$0xff] }
  0x13   :  { %110 = vmatpush.msra.mxu0 %v77_v6  ;;  %v161_v19 = vld [vmem:[%s534_s3 + $0x68] sm:$0xff]  ;;  %v88_v21 = vld [vmem:[#allocation2 + $0xb8] sm:$0xff]  ;;  %v71_v23 = vld [vmem:[#allocation2 + $0x30] sm:$0xff] }
  0x14   :  { %130 = vmatpush.msra.mxu1 %v93_v7  ;;  %169 = vmatpush.msra.mxu2 %v162_v16  ;;  %v160_v22 = vld [vmem:[%s534_s3 + $0x60] sm:$0xff]  ;;  %v87_v24 = vld [vmem:[#allocation2 + $0xb0] sm:$0xff]  ;;  %v70_v26 = vld [vmem:[#allocation2 + $0x28] sm:$0xff] }
  0x15   :  { %111 = vmatpush.msra.mxu0 %v76_v8  ;;  %v159_v25 = vld [vmem:[%s534_s3 + $0x58] sm:$0xff]  ;;  %v86_v27 = vld [vmem:[#allocation2 + $0xa8] sm:$0xff]  ;;  %v69_v29 = vld [vmem:[#allocation2 + $0x20] sm:$0xff] }
  0x16   :  { %131 = vmatpush.msra.mxu1 %v92_v9  ;;  %170 = vmatpush.msra.mxu2 %v161_v19  ;;  %v158_v28 = vld [vmem:[%s534_s3 + $0x50] sm:$0xff]  ;;  %v85_v30 = vld [vmem:[#allocation2 + $0xa0] sm:$0xff]  ;;  %v68_v32 = vld [vmem:[#allocation2 + $0x18] sm:$0xff] }
  0x17   :  { %112 = vmatpush.msra.mxu0 %v75_v10  ;;  %v157_v31 = vld [vmem:[%s534_s3 + $0x48] sm:$0xff]  ;;  %v84_v33 = vld [vmem:[#allocation2 + $0x98] sm:$0xff]  ;;  %v67_v35 = vld [vmem:[#allocation2 + $0x10] sm:$0xff] }
  0x18   :  { %132 = vmatpush.msra.mxu1 %v91_v11  ;;  %171 = vmatpush.msra.mxu2 %v160_v22  ;;  %v156_v34 = vld [vmem:[%s534_s3 + $0x40] sm:$0xff]  ;;  %v83_v36 = vld [vmem:[#allocation2 + $0x90] sm:$0xff]  ;;  %v66_v38 = vld [vmem:[#allocation2 + $0x8] sm:$0xff] }
  0x19   :  { %113 = vmatpush.msra.mxu0 %v74_v12  ;;  %v155_v37 = vld [vmem:[%s534_s3 + $0x38] sm:$0xff]  ;;  %v82_v39 = vld [vmem:[#allocation2 + $0x88] sm:$0xff]  ;;  %v65_v41 = vld [vmem:[#allocation2] sm:$0xff] }
  0x1a   :  { %133 = vmatpush.msra.mxu1 %v90_v13  ;;  %172 = vmatpush.msra.mxu2 %v159_v25  ;;  %v154_v40 = vld [vmem:[%s534_s3 + $0x30] sm:$0xff]  ;;  %v81_v42 = vld [vmem:[#allocation2 + $0x80] sm:$0xff]  ;;  %v103_v43 = vld.sshfl [vmem:[#allocation1] sm:$0xff pattern:$0x73625140] }
  0x1b   :  { %114 = vmatpush.msra.mxu0 %v73_v17  ;;  %v104_v44 = vld.sshfl [vmem:[#allocation1 + $0x8] sm:$0xff pattern:$0x73625140]  ;;  %v152_v46 = vld [vmem:[%s534_s3 + $0x20] sm:$0xff]  ;;  %v151_v47 = vld [vmem:[%s534_s3 + $0x18] sm:$0xff] }
  0x1c   :  { %134 = vmatpush.msra.mxu1 %v89_v18  ;;  %173 = vmatpush.msra.mxu2 %v158_v28  ;;  %v153_v45 = vld [vmem:[%s534_s3 + $0x28] sm:$0xff]  ;;  %v150_v48 = vld [vmem:[%s534_s3 + $0x10] sm:$0xff]  ;;  %v148_v50 = vld [vmem:[%s534_s3] sm:$0xff] }
  0x1d   :  { %115 = vmatpush.msra.mxu0 %v72_v20  ;;  %v149_v49 = vld [vmem:[%s534_s3 + $0x8] sm:$0xff]  ;;  %v196_v51 = vld [vmem:[%s536_s5 + $0x38] sm:$0xff]  ;;  %v195_v52 = vld [vmem:[%s536_s5 + $0x30] sm:$0xff] }
  0x1e   :  { %135 = vmatpush.msra.mxu1 %v88_v21  ;;  %174 = vmatpush.msra.mxu2 %v157_v31  ;;  %v194_v53 = vld [vmem:[%s536_s5 + $0x28] sm:$0xff]  ;;  %v193_v54 = vld [vmem:[%s536_s5 + $0x20] sm:$0xff]  ;;  %v192_v55 = vld [vmem:[%s536_s5 + $0x18] sm:$0xff] }
  0x1f   :  { %116 = vmatpush.msra.mxu0 %v71_v23  ;;  %213 = vmatpush.msra.mxu3 %v196_v51  ;;  %v324_v56 = vld [vmem:[%s533_s2] ss:$0 sm:$0xff]  ;;  %v191_v62 = vld [vmem:[%s536_s5 + $0x10] sm:$0xff]  ;;  %v190_v63 = vld [vmem:[%s536_s5 + $0x8] sm:$0xff] }
  0x20   :  { %136 = vmatpush.msra.mxu1 %v87_v24  ;;  %175 = vmatpush.msra.mxu2 %v156_v34  ;;  %v189_v0 = vld [vmem:[%s536_s5] sm:$0xff]  ;;  %v256_v1 = vld [vmem:[#allocation4 + $0xf0] sm:$0xff]  ;;  %v254_v3 = vld [vmem:[#allocation4 + $0xe0] sm:$0xff] }
  0x21   :  { %117 = vmatpush.msra.mxu0 %v70_v26  ;;  %214 = vmatpush.msra.mxu3 %v195_v52  ;;  %v257_v2 = vld [vmem:[#allocation4 + $0xf8] sm:$0xff]  ;;  %v255_v4 = vld [vmem:[#allocation4 + $0xe8] sm:$0xff]  ;;  %v252_v5 = vld [vmem:[#allocation4 + $0xd0] sm:$0xff] }
  0x22   :  { %137 = vmatpush.msra.mxu1 %v86_v27  ;;  %176 = vmatpush.msra.mxu2 %v155_v37  ;;  %v253_v6 = vld [vmem:[#allocation4 + $0xd8] sm:$0xff]  ;;  %v250_v7 = vld [vmem:[#allocation4 + $0xc0] sm:$0xff]  ;;  %v251_v8 = vld [vmem:[#allocation4 + $0xc8] sm:$0xff] }
  0x23   :  { %118 = vmatpush.msra.mxu0 %v69_v29  ;;  %215 = vmatpush.msra.mxu3 %v194_v53  ;;  %v248_v9 = vld [vmem:[#allocation4 + $0xb0] sm:$0xff]  ;;  %v249_v10 = vld [vmem:[#allocation4 + $0xb8] sm:$0xff]  ;;  %v246_v11 = vld [vmem:[#allocation4 + $0xa0] sm:$0xff] }
  0x24   :  { %138 = vmatpush.msra.mxu1 %v85_v30  ;;  %177 = vmatpush.msra.mxu2 %v154_v40  ;;  %v247_v12 = vld [vmem:[#allocation4 + $0xa8] sm:$0xff]  ;;  %v244_v13 = vld [vmem:[#allocation4 + $0x90] sm:$0xff]  ;;  %v245_v14 = vld [vmem:[#allocation4 + $0x98] sm:$0xff] }
  0x25   :  { %119 = vmatpush.msra.mxu0 %v68_v32  ;;  %216 = vmatpush.msra.mxu3 %v193_v54  ;;  %v242_v15 = vld [vmem:[#allocation4 + $0x80] sm:$0xff]  ;;  %v243_v16 = vld [vmem:[#allocation4 + $0x88] sm:$0xff]  ;;  %v240_v17 = vld [vmem:[#allocation4 + $0x70] sm:$0xff] }
  0x26   :  { %139 = vmatpush.msra.mxu1 %v84_v33  ;;  %178 = vmatpush.msra.mxu2 %v153_v45  ;;  %v241_v18 = vld [vmem:[#allocation4 + $0x78] sm:$0xff]  ;;  %v238_v19 = vld [vmem:[#allocation4 + $0x60] sm:$0xff]  ;;  %v239_v20 = vld [vmem:[#allocation4 + $0x68] sm:$0xff] }
  0x27   :  { %120 = vmatpush.msra.mxu0 %v67_v35  ;;  %217 = vmatpush.msra.mxu3 %v192_v55  ;;  %v236_v21 = vld [vmem:[#allocation4 + $0x50] sm:$0xff]  ;;  %v237_v22 = vld [vmem:[#allocation4 + $0x58] sm:$0xff]  ;;  %v234_v23 = vld [vmem:[#allocation4 + $0x40] sm:$0xff] }
  0x28   :  { %140 = vmatpush.msra.mxu1 %v83_v36  ;;  %179 = vmatpush.msra.mxu2 %v152_v46  ;;  %v235_v24 = vld [vmem:[#allocation4 + $0x48] sm:$0xff]  ;;  %v232_v25 = vld [vmem:[#allocation4 + $0x30] sm:$0xff]  ;;  %v233_v26 = vld [vmem:[#allocation4 + $0x38] sm:$0xff] }
  0x29   :  { %121 = vmatpush.msra.mxu0 %v66_v38  ;;  %218 = vmatpush.msra.mxu3 %v191_v62  ;;  %v325_v27 = vld [vmem:[%s535_s4] ss:$0 sm:$0xff]  ;;  %v230_v31 = vld [vmem:[#allocation4 + $0x20] sm:$0xff]  ;;  %v231_v32 = vld [vmem:[#allocation4 + $0x28] sm:$0xff] }
  0x2a   :  { %141 = vmatpush.msra.mxu1 %v82_v39  ;;  %180 = vmatpush.msra.mxu2 %v151_v47  ;;  %v228_v33 = vld [vmem:[#allocation4 + $0x10] sm:$0xff]  ;;  %v229_v34 = vld [vmem:[#allocation4 + $0x18] sm:$0xff]  ;;  %v226_v35 = vld [vmem:[#allocation4] sm:$0xff] }
  0x2b   :  { %122 = vmatpush.msra.mxu0 %v65_v41  ;;  %219 = vmatpush.msra.mxu3 %v190_v63  ;;  %v227_v36 = vld [vmem:[#allocation4 + $0x8] sm:$0xff]  ;;  %v326_v37 = vld [vmem:[%s537_s6] ss:$0 sm:$0xff] }
  0x2c   :  { %142 = vmatpush.msra.mxu1 %v81_v42  ;;  %123 = vmatmul.f32.vlgmr.msra.gmra.mxu0 %v103_v43  ;;  %v258_v41 = vld [vmem:[%s539_s8] sm:$0x3] }
  0x2d   :  { %143 = vmatmul.f32.vlgmr.msra.gmra.mxu1 %v104_v44  ;;  %181 = vmatpush.msra.mxu2 %v150_v48  ;;  %v261_v42 = vperm.slane %v258_v41, 1  ;;  %v260_v45 = vperm.slane %v258_v41, 0 }
  0x2e   :  { %220 = vmatpush.msra.mxu3 %v189_v0  ;;  %284 = vmatpush.msrb.mxu0 %v257_v2 }
  0x2f   :  { %182 = vmatpush.msra.mxu2 %v149_v49 }
  0x30   :  { %264 = vmatpush.msrb.mxu3 %v256_v1  ;;  %285 = vmatpush.msrb.mxu0 %v255_v4 }
  0x31   :  { %183 = vmatpush.msra.mxu2 %v148_v50 }
  0x32   :  { %265 = vmatpush.msrb.mxu3 %v254_v3  ;;  %286 = vmatpush.msrb.mxu0 %v253_v6 }
  0x34   :  { %266 = vmatpush.msrb.mxu3 %v252_v5  ;;  %287 = vmatpush.msrb.mxu0 %v251_v8 }
  0x36   :  { %267 = vmatpush.msrb.mxu3 %v250_v7  ;;  %288 = vmatpush.msrb.mxu0 %v249_v10 }
  0x38   :  { %268 = vmatpush.msrb.mxu3 %v248_v9  ;;  %289 = vmatpush.msrb.mxu0 %v247_v12 }
  0x3a   :  { %269 = vmatpush.msrb.mxu3 %v246_v11  ;;  %290 = vmatpush.msrb.mxu0 %v245_v14 }
  0x3c   :  { %270 = vmatpush.msrb.mxu3 %v244_v13  ;;  %291 = vmatpush.msrb.mxu0 %v243_v16 }
  0x3e   :  { %271 = vmatpush.msrb.mxu3 %v242_v15  ;;  %292 = vmatpush.msrb.mxu0 %v241_v18 }
  0x40   :  { %272 = vmatpush.msrb.mxu3 %v240_v17  ;;  %293 = vmatpush.msrb.mxu0 %v239_v20 }
  0x42   :  { %273 = vmatpush.msrb.mxu3 %v238_v19  ;;  %294 = vmatpush.msrb.mxu0 %v237_v22 }
  0x44   :  { %274 = vmatpush.msrb.mxu3 %v236_v21  ;;  %295 = vmatpush.msrb.mxu0 %v235_v24 }
  0x46   :  { %275 = vmatpush.msrb.mxu3 %v234_v23  ;;  %296 = vmatpush.msrb.mxu0 %v233_v26 }
  0x48   :  { %276 = vmatpush.msrb.mxu3 %v232_v25  ;;  %297 = vmatpush.msrb.mxu0 %v231_v32 }
  0x4a   :  { %277 = vmatpush.msrb.mxu3 %v230_v31  ;;  %298 = vmatpush.msrb.mxu0 %v229_v34 }
  0x4c   :  { %278 = vmatpush.msrb.mxu3 %v228_v33  ;;  %299 = vmatpush.msrb.mxu0 %v227_v36 }
  0x4e   :  { %279 = vmatpush.msrb.mxu3 %v226_v35 }
  0xa9   :  { %v124_v57 = vpop.f32.mrf.mxu0 }
  0xaa   :  { %v144_v58 = vpop.f32.mrf.mxu1  ;;  %v125_v59 = vadd.f32 %v324_v56, %v124_v57 }
  0xac   :  { %v145_v60 = vadd.f32 %v144_v58, %v125_v59 }
  0xae   :  { %v147_v61 = vmax.f32 %v145_v60, 0.0 }
  0xb0   :  { %184 = vmatmul.f32.vlgmr.msra.gmra.mxu2 %v147_v61 }
 0x133   :  { %v185_v28 = vpop.f32.mrf.mxu2 }
 0x134   :  { %v186_v29 = vadd.f32 %v325_v27, %v185_v28 }
 0x136   :  { %v188_v30 = vmax.f32 %v186_v29, 0.0 }
 0x138   :  { %317 = vmatmul.msk.f32.vlgmr.msra.gmra.mxu3 %vm201_vm0, %v188_v30 }
 0x1bb   :  { %v222_v38 = vpop.f32.mrf.mxu3 }
 0x1bc   :  { %v223_v39 = vadd.f32 %v326_v37, %v222_v38 }
 0x1be   :  { %v225_v40 = vmax.f32 %v223_v39, 0.0 }
 0x1c0   :  { %280 = vmatmul.f32.vlgmr.msrb.gmra.mxu3 %v225_v40  ;;  %300 = vmatmul.f32.vlgmr.msrb.gmra.mxu0 %v225_v40 }
 0x23d   :  { %v301_v43 = vpop.f32.mrf.mxu0 }
 0x23e   :  { %v302_v44 = vadd.f32 %v301_v43, %v261_v42 }
 0x240   :  { %v306_v47 = vrot.slane %v302_v44, 6 }
 0x243   :  { %v281_v46 = vpop.f32.mrf.mxu3 }
 0x244   :  { %v282_v48 = vadd.f32 %v281_v46, %v260_v45 }
 0x246   :  { %v308_v49 = vsel %vm307_vm1, %v282_v48, %v306_v47 }
 0x247   :  { %310 = vst [vmem:[%s540_s9] sm:$0xf] %v308_v49 }
 0x248   :  { %315 = vsyncpa [#allocation3], 1 }
 0x249   :  { %316 = vsyncpa [#allocation5], 1 }

</bundles_post_ra>
